<compile_context>
chip_gen: v7x
topology: tpu7x:2x2x1
jax: 0.10.0
libtpu: 0.0.40
codegen_flags: <defaults>
</compile_context>

<pallas_src>
import math

import jax
import jax.numpy as jnp
from jax.experimental import pallas as pl
from jax.experimental.pallas import tpu as pltpu


_SQRT1_2 = 0.7071067811865476


# --------------------------------- kernels -----------------------------------
def _gelu_exact(x):
    # exact (erf-based) GELU == torch.nn.GELU(approximate='none');
    # lax.erf lowers to the EUP, keeping the VALU free.
    return 0.5 * x * (1.0 + jax.lax.erf(x * _SQRT1_2))


def ffn_kernel_fused(x_ref, w1_ref, b1_ref, w2_ref, b2_ref, o_ref):
    """Whole hidden dim in one shot: no accumulator, direct store."""
    h = jnp.dot(x_ref[...], w1_ref[...],
                preferred_element_type=jnp.float32) + b1_ref[...]
    h = _gelu_exact(h)
    y = jnp.dot(h, w2_ref[...], preferred_element_type=jnp.float32) + b2_ref[...]
    o_ref[...] = y.astype(o_ref.dtype)


def ffn_kernel_chunked(x_ref, w1_ref, b1_ref, w2_ref, b2_ref, o_ref, acc_ref):
    """Hidden dim streamed in chunks along the last (reduction) grid axis."""
    hi = pl.program_id(1)

    @pl.when(hi == 0)
    def _init():
        acc_ref[...] = jnp.zeros_like(acc_ref)

    # first linear on this hidden-dim chunk + exact GELU
    h = jnp.dot(x_ref[...], w1_ref[...],
                preferred_element_type=jnp.float32) + b1_ref[...]
    h = _gelu_exact(h)

    # second linear: partial contribution of this hidden chunk
    acc_ref[...] += jnp.dot(h, w2_ref[...], preferred_element_type=jnp.float32)

    @pl.when(hi == pl.num_programs(1) - 1)
    def _finalize():
        o_ref[...] = (acc_ref[...] + b2_ref[...]).astype(o_ref.dtype)


# -------------------------------- wrapper ------------------------------------
def _round_up(v, m):
    return ((v + m - 1) // m) * m


def positionwise_feed_forward(x, w1, b1, w2, b2, *,
                              block_m=512,
                              weight_chunk_budget_bytes=8 << 20):
    """y = GELU(x @ w1 + b1) @ w2 + b2 over the last axis of x.

    w1: (in_dim, hidden)   b1: (hidden,)
    w2: (hidden, in_dim)   b2: (in_dim,)
    (weights are stored transposed relative to torch.nn.Linear.weight)
    Dropout is the identity at inference.
    """
    in_dim = x.shape[-1]
    hidden = w1.shape[-1]
    lead = x.shape[:-1]
    m_rows = int(math.prod(lead)) if lead else 1

    x2 = x.reshape(m_rows, in_dim).astype(jnp.float32)

    # ---- row tiling: big blocks, padded to a sublane multiple ----
    bm = min(block_m, _round_up(m_rows, 8))
    m_pad = _round_up(m_rows, bm)
    if m_pad != m_rows:
        x2 = jnp.pad(x2, ((0, m_pad - m_rows), (0, 0)))

    w1p = w1.astype(jnp.float32)
    b1p = b1.reshape(1, hidden).astype(jnp.float32)
    w2p = w2.astype(jnp.float32)
    b2p = b2.reshape(1, in_dim).astype(jnp.float32)

    # ---- hidden-dim chunk size from a VMEM budget (both weight chunks) ----
    bytes_per_h_col = max(1, 2 * in_dim * 4)            # w1 col + w2 row, f32
    max_bh = max(128, (weight_chunk_budget_bytes // bytes_per_h_col) // 128 * 128)

    if hidden <= max_bh:
        # ------------------ fast path: single hidden chunk -------------------
        # Weights/biases map to block (0, 0) for every grid step -> stay
        # resident in VMEM; no accumulator scratch, no pl.when.
        grid = (m_pad // bm,)
        out = pl.pallas_call(
            ffn_kernel_fused,
            grid=grid,
            in_specs=[
                pl.BlockSpec((bm, in_dim), lambda mi: (mi, 0)),      # x tile
                pl.BlockSpec((in_dim, hidden), lambda mi: (0, 0)),   # w1
                pl.BlockSpec((1, hidden), lambda mi: (0, 0)),        # b1
                pl.BlockSpec((hidden, in_dim), lambda mi: (0, 0)),   # w2
                pl.BlockSpec((1, in_dim), lambda mi: (0, 0)),        # b2
            ],
            out_specs=pl.BlockSpec((bm, in_dim), lambda mi: (mi, 0)),
            out_shape=jax.ShapeDtypeStruct((m_pad, in_dim), jnp.float32),
            compiler_params=pltpu.CompilerParams(
                dimension_semantics=("parallel",)),
        )(x2, w1p, b1p, w2p, b2p)
    else:
        # --------------- chunked path: stream hidden-dim chunks --------------
        bh = max_bh
        h_pad = _round_up(hidden, bh)
        if h_pad != hidden:
            # zero padding is exact: gelu(0 + 0)=0 and padded w2 rows are zero
            w1p = jnp.pad(w1p, ((0, 0), (0, h_pad - hidden)))
            b1p = jnp.pad(b1p, ((0, 0), (0, h_pad - hidden)))
            w2p = jnp.pad(w2p, ((0, h_pad - hidden), (0, 0)))

        grid = (m_pad // bm, h_pad // bh)
        out = pl.pallas_call(
            ffn_kernel_chunked,
            grid=grid,
            in_specs=[
                pl.BlockSpec((bm, in_dim), lambda mi, hi: (mi, 0)),   # x tile
                pl.BlockSpec((in_dim, bh), lambda mi, hi: (0, hi)),   # w1 chunk
                pl.BlockSpec((1, bh), lambda mi, hi: (0, hi)),        # b1 chunk
                pl.BlockSpec((bh, in_dim), lambda mi, hi: (hi, 0)),   # w2 chunk
                pl.BlockSpec((1, in_dim), lambda mi, hi: (0, 0)),     # b2
            ],
            out_specs=pl.BlockSpec((bm, in_dim), lambda mi, hi: (mi, 0)),
            out_shape=jax.ShapeDtypeStruct((m_pad, in_dim), jnp.float32),
            scratch_shapes=[pltpu.VMEM((bm, in_dim), jnp.float32)],
            compiler_params=pltpu.CompilerParams(
                dimension_semantics=("parallel", "arbitrary")),
        )(x2, w1p, b1p, w2p, b2p)

    return out[:m_rows].reshape(*lead, in_dim)


# --------------------------- pure-JAX reference ------------------------------
def reference_forward(x, w1, b1, w2, b2):
    h = jax.nn.gelu(x @ w1 + b1, approximate=False)
    return h @ w2 + b2
    # dropout is identity in eval mode; `kv` arg of the torch forward is unused


# ----------------------------------- main ------------------------------------
if __name__ == "__main__":
    # small shapes consistent with TESTAM usage: hidden states (B, N, T, C)
    B, N, T, in_dim = 2, 4, 8, 32
    hidden_dim = 4 * in_dim  # 128
    # TODO(synk): torch dropout(p) at train time would need an RNG mask; here
    #             we implement eval-mode semantics (identity), as nn.Dropout
    #             is a no-op in inference.

    key = jax.random.PRNGKey(0)
    kx, k1, k2, k3, k4 = jax.random.split(key, 5)
    x = jax.random.normal(kx, (B, N, T, in_dim), dtype=jnp.float32)
    w1 = (0.1 * jax.random.normal(k1, (in_dim, hidden_dim))).astype(jnp.float32)
    b1 = (0.1 * jax.random.normal(k2, (hidden_dim,))).astype(jnp.float32)
    w2 = (0.1 * jax.random.normal(k3, (hidden_dim, in_dim))).astype(jnp.float32)
    b2 = (0.1 * jax.random.normal(k4, (in_dim,))).astype(jnp.float32)

    y = positionwise_feed_forward(x, w1, b1, w2, b2)
    y = jax.block_until_ready(y)

    y_ref = reference_forward(x, w1, b1, w2, b2)
    assert y.shape == (B, N, T, in_dim)
    assert jnp.allclose(y, y_ref, atol=2e-4, rtol=2e-4), \
        float(jnp.max(jnp.abs(y - y_ref)))

    # also exercise the chunked (hidden-streaming) path for correctness
    y2 = positionwise_feed_forward(x, w1, b1, w2, b2,
                                   weight_chunk_budget_bytes=64 * 2 * in_dim * 4)
    y2 = jax.block_until_ready(y2)
    assert jnp.allclose(y2, y_ref, atol=2e-4, rtol=2e-4), \
        float(jnp.max(jnp.abs(y2 - y_ref)))

    print("KERNEL_OK")
</pallas_src>

<mosaic_0001>
module attributes {stable_mosaic.version = 11 : i64} {
  func.func @ffn_kernel_fused(%arg0: i32, %arg1: memref<64x32xf32, #tpu.memory_space<vmem>>, %arg2: memref<32x128xf32, #tpu.memory_space<vmem>>, %arg3: memref<1x128xf32, #tpu.memory_space<vmem>>, %arg4: memref<128x32xf32, #tpu.memory_space<vmem>>, %arg5: memref<1x32xf32, #tpu.memory_space<vmem>>, %arg6: memref<64x32xf32, #tpu.memory_space<vmem>>) attributes {dimension_semantics = [#tpu.dimension_semantics<parallel>], iteration_bounds = array<i64: 1>, scalar_prefetch = 0 : i64, scratch_operands = 0 : i64, tpu.core_type = #tpu.core_type<tc>, window_params = [{transform_indices = @transform_0, window_bounds = array<i64: 64, 32>}, {pipeline_mode = #tpu.pipeline_mode<synchronous>, transform_indices = @transform_1, window_bounds = array<i64: 32, 128>}, {pipeline_mode = #tpu.pipeline_mode<synchronous>, transform_indices = @transform_2, window_bounds = array<i64: 1, 128>}, {pipeline_mode = #tpu.pipeline_mode<synchronous>, transform_indices = @transform_3, window_bounds = array<i64: 128, 32>}, {pipeline_mode = #tpu.pipeline_mode<synchronous>, transform_indices = @transform_4, window_bounds = array<i64: 1, 32>}, {transform_indices = @transform_5, window_bounds = array<i64: 64, 32>}]} {
    %c0 = arith.constant 0 : index
    %c0_0 = arith.constant 0 : index
    %0 = vector.load %arg1[%c0, %c0_0] : memref<64x32xf32, #tpu.memory_space<vmem>>, vector<64x32xf32>
    %c0_1 = arith.constant 0 : index
    %c0_2 = arith.constant 0 : index
    %1 = vector.load %arg2[%c0_1, %c0_2] : memref<32x128xf32, #tpu.memory_space<vmem>>, vector<32x128xf32>
    %cst = arith.constant dense<0.000000e+00> : vector<64x128xf32>
    %2 = tpu.matmul %0, %1, %cst {dimension_numbers = #tpu.dot_dimension_numbers<[1], [0], [0], [1], [0, 0, 1, 1], [], []>} : vector<64x32xf32>, vector<32x128xf32>, vector<64x128xf32> -> vector<64x128xf32>
    %c0_3 = arith.constant 0 : index
    %c0_4 = arith.constant 0 : index
    %3 = vector.load %arg3[%c0_3, %c0_4] : memref<1x128xf32, #tpu.memory_space<vmem>>, vector<1x128xf32>
    %4 = vector.broadcast %3 : vector<1x128xf32> to vector<64x128xf32>
    %5 = arith.addf %2, %4 : vector<64x128xf32>
    %cst_5 = arith.constant 5.000000e-01 : f32
    %6 = vector.broadcast %cst_5 : f32 to vector<64x128xf32>
    %7 = arith.mulf %6, %5 : vector<64x128xf32>
    %cst_6 = arith.constant 0.707106769 : f32
    %8 = vector.broadcast %cst_6 : f32 to vector<64x128xf32>
    %9 = arith.mulf %5, %8 : vector<64x128xf32>
    %10 = math.erf %9 : vector<64x128xf32>
    %cst_7 = arith.constant 1.000000e+00 : f32
    %11 = vector.broadcast %cst_7 : f32 to vector<64x128xf32>
    %12 = arith.addf %11, %10 : vector<64x128xf32>
    %13 = arith.mulf %7, %12 : vector<64x128xf32>
    %c0_8 = arith.constant 0 : index
    %c0_9 = arith.constant 0 : index
    %14 = vector.load %arg4[%c0_8, %c0_9] : memref<128x32xf32, #tpu.memory_space<vmem>>, vector<128x32xf32>
    %cst_10 = arith.constant dense<0.000000e+00> : vector<64x32xf32>
    %15 = tpu.matmul %13, %14, %cst_10 {dimension_numbers = #tpu.dot_dimension_numbers<[1], [0], [0], [1], [0, 0, 1, 1], [], []>} : vector<64x128xf32>, vector<128x32xf32>, vector<64x32xf32> -> vector<64x32xf32>
    %c0_11 = arith.constant 0 : index
    %c0_12 = arith.constant 0 : index
    %16 = vector.load %arg5[%c0_11, %c0_12] : memref<1x32xf32, #tpu.memory_space<vmem>>, vector<1x32xf32>
    %17 = vector.broadcast %16 : vector<1x32xf32> to vector<64x32xf32>
    %18 = arith.addf %15, %17 : vector<64x32xf32>
    %c0_13 = arith.constant 0 : index
    %c0_14 = arith.constant 0 : index
    %19 = vector.load %arg6[%c0_13, %c0_14] : memref<64x32xf32, #tpu.memory_space<vmem>>, vector<64x32xf32>
    tpu.vector_store %arg6[%c0_13, %c0_14], %18 {strides = array<i32>} : memref<64x32xf32, #tpu.memory_space<vmem>>, vector<64x32xf32>,
    return
  }
  func.func @transform_0(%arg0: i32) -> (i32, i32) {
    %c0_i32 = arith.constant 0 : i32
    %c0_i32_0 = arith.constant 0 : i32
    return %arg0, %c0_i32 : i32, i32
  }
  func.func @transform_1(%arg0: i32) -> (i32, i32) {
    %c0_i32 = arith.constant 0 : i32
    %c0_i32_0 = arith.constant 0 : i32
    %c0_i32_1 = arith.constant 0 : i32
    return %c0_i32, %c0_i32_0 : i32, i32
  }
  func.func @transform_2(%arg0: i32) -> (i32, i32) {
    %c0_i32 = arith.constant 0 : i32
    %c0_i32_0 = arith.constant 0 : i32
    %c0_i32_1 = arith.constant 0 : i32
    return %c0_i32, %c0_i32_0 : i32, i32
  }
  func.func @transform_3(%arg0: i32) -> (i32, i32) {
    %c0_i32 = arith.constant 0 : i32
    %c0_i32_0 = arith.constant 0 : i32
    %c0_i32_1 = arith.constant 0 : i32
    return %c0_i32, %c0_i32_0 : i32, i32
  }
  func.func @transform_4(%arg0: i32) -> (i32, i32) {
    %c0_i32 = arith.constant 0 : i32
    %c0_i32_0 = arith.constant 0 : i32
    %c0_i32_1 = arith.constant 0 : i32
    return %c0_i32, %c0_i32_0 : i32, i32
  }
  func.func @transform_5(%arg0: i32) -> (i32, i32) {
    %c0_i32 = arith.constant 0 : i32
    %c0_i32_0 = arith.constant 0 : i32
    return %arg0, %c0_i32 : i32, i32
  }
}

</mosaic_0001>

<bundles_post_ra>
// kernel: tpu_custom_call.1
= control target key start
LH: loop header
LB: loop body
LE: loop exit
PB: predicated region body
PF: predicated region fallthrough
CT: control target
= control target key end

     0   :  { %vm39_vm0 = vcmask 261120   ;;  %s691_s1 = inlined_call_operand.vmem [shape: f32[32,128], index: 1, kind: input, shape index: {}]   ;;  %s692_s0 = inlined_call_operand.vmem [shape: f32[64,32], index: 0, kind: input, shape index: {}]   ;;  %s693_s3 = inlined_call_operand.vmem [shape: f32[128,32], index: 3, kind: input, shape index: {}]   ;;  %s694_s2 = inlined_call_operand.vmem [shape: f32[1,128], index: 2, kind: input, shape index: {}]   ;;  %s695_s4 = inlined_call_operand.vmem [shape: f32[1,32], index: 4, kind: input, shape index: {}]   ;;  %s696_s5 = inlined_call_operand.vmem [shape: f32[64,32], index: 5, kind: output, shape index: {}]  }
   0x1   :  { %v28_v0 = vld [vmem:[%s691_s1] sm:$0xff]  ;;  %v29_v1 = vld [vmem:[%s691_s1 + $0x8] sm:$0xff]  ;;  %v30_v2 = vld [vmem:[%s691_s1 + $0x10] sm:$0xff] }
   0x2   :  { %v459_v3 = vpack.c.bf16 %v29_v1, %v28_v0  ;;  %v31_v4 = vld [vmem:[%s691_s1 + $0x18] sm:$0xff]  ;;  %v20_v5 = vld [vmem:[%s692_s0] sm:$0xff]  ;;  %v210_v8 = vld [vmem:[%s693_s3 + $0x8] sm:$0xff] }
   0x3   :  { %v463_v6 = vpack.c.bf16 %v31_v4, %v30_v2  ;;  %403 = vmatprep.mubr.msk.f32.mxu0 %vm39_vm0, %v20_v5  ;;  %v209_v7 = vld [vmem:[%s693_s3] sm:$0xff]  ;;  %v211_v9 = vld [vmem:[%s693_s3 + $0x10] sm:$0xff]  ;;  %v212_v11 = vld [vmem:[%s693_s3 + $0x18] sm:$0xff] }
   0x4   :  { %460 = vmatprep.subr.bf16.mxu0 %v459_v3  ;;  %v467_v10 = vpack.c.bf16 %v210_v8, %v209_v7  ;;  %v471_v12 = vpack.c.bf16 %v212_v11, %v211_v9  ;;  %v21_v13 = vld [vmem:[%s692_s0 + $0x8] sm:$0xff]  ;;  %v22_v14 = vld [vmem:[%s692_s0 + $0x10] sm:$0xff]  ;;  %v213_v15 = vld [vmem:[%s693_s3 + $0x20] sm:$0xff] }
   0x5   :  { %462 = vmatpush3.bf16.msra.mxu0 %v459_v3  ;;  %v214_v16 = vld [vmem:[%s693_s3 + $0x28] sm:$0xff]  ;;  %v23_v17 = vld [vmem:[%s692_s0 + $0x18] sm:$0xff]  ;;  %v24_v19 = vld [vmem:[%s692_s0 + $0x20] sm:$0xff] }
   0x6   :  { %464 = vmatprep.subr.bf16.mxu0 %v463_v6  ;;  %499 = vmatprep.subr.bf16.mxu1 %v467_v10  ;;  %v475_v18 = vpack.c.bf16 %v214_v16, %v213_v15  ;;  %v25_v20 = vld [vmem:[%s692_s0 + $0x28] sm:$0xff]  ;;  %v26_v21 = vld [vmem:[%s692_s0 + $0x30] sm:$0xff]  ;;  %v27_v22 = vld [vmem:[%s692_s0 + $0x38] sm:$0xff] }
   0x7   :  { %507 = vmatpush3.bf16.msra.mxu1 %v467_v10  ;;  %v215_v23 = vld [vmem:[%s693_s3 + $0x30] sm:$0xff]  ;;  %v216_v24 = vld [vmem:[%s693_s3 + $0x38] sm:$0xff]  ;;  %v217_v26 = vld [vmem:[%s693_s3 + $0x40] sm:$0xff] }
   0x8   :  { %500 = vmatprep.subr.bf16.mxu1 %v471_v12  ;;  %v479_v25 = vpack.c.bf16 %v216_v24, %v215_v23  ;;  %v218_v27 = vld [vmem:[%s693_s3 + $0x48] sm:$0xff]  ;;  %v219_v29 = vld [vmem:[%s693_s3 + $0x50] sm:$0xff]  ;;  %v220_v30 = vld [vmem:[%s693_s3 + $0x58] sm:$0xff] }
   0x9   :  { %466 = vmatpush3.bf16.msra.mxu0 %v463_v6  ;;  %v483_v28 = vpack.c.bf16 %v218_v27, %v217_v26  ;;  %v487_v31 = vpack.c.bf16 %v220_v30, %v219_v29  ;;  %v221_v32 = vld [vmem:[%s693_s3 + $0x60] sm:$0xff]  ;;  %v222_v33 = vld [vmem:[%s693_s3 + $0x68] sm:$0xff]  ;;  %v223_v35 = vld [vmem:[%s693_s3 + $0x70] sm:$0xff] }
   0xa   :  { %468 = vmatprep.subr.bf16.mxu0 %v467_v10  ;;  %v491_v34 = vpack.c.bf16 %v222_v33, %v221_v32  ;;  %v224_v36 = vld [vmem:[%s693_s3 + $0x78] sm:$0xff]  ;;  %v349_v38 = vld [vmem:[%s694_s2] ss:$0 sm:$0xff] }
   0xb   :  { %508 = vmatpush3.bf16.msra.mxu1 %v471_v12  ;;  %v495_v37 = vpack.c.bf16 %v224_v36, %v223_v35 }
   0xc   :  { %404 = vmatmul.mubr.msk.f32.vlgmr.msra.gmra.mrb[0].mxu0 %vm39_vm0, %v21_v13  ;;  %501 = vmatprep.subr.bf16.mxu1 %v475_v18 }
   0xd   :  { %406 = vmatprep.mubr.msk.f32.mxu0 %vm39_vm0, %v22_v14  ;;  %470 = vmatpush3.bf16.msra.mxu0 %v467_v10 }
   0xe   :  { %472 = vmatprep.subr.bf16.mxu0 %v471_v12 }
   0xf   :  { %509 = vmatpush3.bf16.msra.mxu1 %v475_v18 }
  0x10   :  { %407 = vmatmul.mubr.msk.f32.gmra.mrb[2].mxu0 %vm39_vm0, %v23_v17  ;;  %502 = vmatprep.subr.bf16.mxu1 %v479_v25 }
  0x11   :  { %409 = vmatprep.mubr.msk.f32.mxu0 %vm39_vm0, %v24_v19  ;;  %474 = vmatpush3.bf16.msra.mxu0 %v471_v12 }
  0x12   :  { %476 = vmatprep.subr.bf16.mxu0 %v475_v18 }
  0x13   :  { %510 = vmatpush3.bf16.msra.mxu1 %v479_v25 }
  0x14   :  { %410 = vmatmul.mubr.msk.f32.gmra.mrb[4].mxu0 %vm39_vm0, %v25_v20  ;;  %503 = vmatprep.subr.bf16.mxu1 %v483_v28 }
  0x15   :  { %412 = vmatprep.mubr.msk.f32.mxu0 %vm39_vm0, %v26_v21  ;;  %478 = vmatpush3.bf16.msra.mxu0 %v475_v18 }
  0x16   :  { %480 = vmatprep.subr.bf16.mxu0 %v479_v25 }
  0x17   :  { %511 = vmatpush3.bf16.msra.mxu1 %v483_v28 }
  0x18   :  { %413 = vmatmul.mubr.msk.f32.gmra.mrb[6].mxu0 %vm39_vm0, %v27_v22  ;;  %504 = vmatprep.subr.bf16.mxu1 %v487_v31 }
  0x19   :  { %482 = vmatpush3.bf16.msra.mxu0 %v479_v25 }
  0x1a   :  { %484 = vmatprep.subr.bf16.mxu0 %v483_v28 }
  0x1b   :  { %512 = vmatpush3.bf16.msra.mxu1 %v487_v31 }
  0x1c   :  { %505 = vmatprep.subr.bf16.mxu1 %v491_v34 }
  0x1d   :  { %486 = vmatpush3.bf16.msra.mxu0 %v483_v28 }
  0x1e   :  { %488 = vmatprep.subr.bf16.mxu0 %v487_v31 }
  0x1f   :  { %513 = vmatpush3.bf16.msra.mxu1 %v491_v34 }
  0x20   :  { %506 = vmatprep.subr.bf16.mxu1 %v495_v37 }
  0x21   :  { %490 = vmatpush3.bf16.msra.mxu0 %v487_v31  ;;  %v358_v31 = vld [vmem:[%s695_s4] ss:$0 sm:$0xff] }
  0x22   :  { %492 = vmatprep.subr.bf16.mxu0 %v491_v34 }
  0x23   :  { %514 = vmatpush3.bf16.msra.mxu1 %v495_v37 }
  0x25   :  { %494 = vmatpush3.bf16.msra.mxu0 %v491_v34 }
  0x26   :  { %496 = vmatprep.subr.bf16.mxu0 %v495_v37 }
  0x29   :  { %498 = vmatpush3.bf16.msra.mxu0 %v495_v37 }
  0xdf   :  { %v405_v39 = vpop.f32.mrb[0].mxu0 }
  0xe0   :  { %v136_v40 = vadd.f32 %v405_v39, %v349_v38  ;;  %v130_v41 = vpop.f32.mrb[1].mxu0 }
  0xe1   :  { %v131_v42 = vadd.f32 %v349_v38, %v130_v41 }
  0xe2   :  { %v178_v43 = vmul.f32 0.70710677, %v136_v40  ;;  %v170_v4 = vmul.f32 0.5, %v136_v40 }
  0xe3   :  { %v177_v44 = vmul.f32 0.70710677, %v131_v42  ;;  %v408_v45 = vpop.f32.mrb[2].mxu0  ;;  %v169_v2 = vmul.f32 0.5, %v131_v42 }
  0xe4   :  { %515 = verf.f32 %v178_v43  ;;  %v146_v46 = vadd.f32 %v408_v45, %v349_v38  ;;  %v140_v47 = vpop.f32.mrb[3].mxu0 }
  0xe5   :  { %517 = verf.f32 %v177_v44  ;;  %v141_v48 = vadd.f32 %v349_v38, %v140_v47 }
  0xe6   :  { %v180_v49 = vmul.f32 0.70710677, %v146_v46  ;;  %v172_v12 = vmul.f32 0.5, %v146_v46 }
  0xe7   :  { %v179_v50 = vmul.f32 0.70710677, %v141_v48  ;;  %v411_v51 = vpop.f32.mrb[4].mxu0  ;;  %v171_v10 = vmul.f32 0.5, %v141_v48 }
  0xe8   :  { %519 = verf.f32 %v180_v49  ;;  %v156_v52 = vadd.f32 %v411_v51, %v349_v38  ;;  %v150_v53 = vpop.f32.mrb[5].mxu0 }
  0xe9   :  { %521 = verf.f32 %v179_v50  ;;  %v151_v54 = vadd.f32 %v349_v38, %v150_v53 }
  0xea   :  { %v182_v55 = vmul.f32 0.70710677, %v156_v52  ;;  %v174_v20 = vmul.f32 0.5, %v156_v52 }
  0xeb   :  { %v181_v56 = vmul.f32 0.70710677, %v151_v54  ;;  %v414_v57 = vpop.f32.mrb[6].mxu0  ;;  %v173_v18 = vmul.f32 0.5, %v151_v54 }
  0xec   :  { %523 = verf.f32 %v182_v55  ;;  %v166_v58 = vadd.f32 %v414_v57, %v349_v38  ;;  %v160_v59 = vpop.f32.mrb[7].mxu0 }
  0xed   :  { %525 = verf.f32 %v181_v56  ;;  %v161_v60 = vadd.f32 %v349_v38, %v160_v59 }
  0xee   :  { %v516_v61 = vpop.eup %515  ;;  %v184_v62 = vmul.f32 0.70710677, %v166_v58  ;;  %v176_v28 = vmul.f32 0.5, %v166_v58 }
  0xef   :  { %v518_v63 = vpop.eup %517  ;;  %v194_v0 = vadd.f32 1.0, %v516_v61  ;;  %v183_v1 = vmul.f32 0.70710677, %v161_v60  ;;  %v175_v26 = vmul.f32 0.5, %v161_v60 }
  0xf0   :  { %v193_v3 = vadd.f32 1.0, %v518_v63  ;;  %527 = verf.f32 %v184_v62 }
  0xf1   :  { %529 = verf.f32 %v183_v1  ;;  %v202_v8 = vmul.f32 %v194_v0, %v170_v4 }
  0xf2   :  { %v520_v5 = vpop.eup %519  ;;  %v201_v6 = vmul.f32 %v193_v3, %v169_v2 }
  0xf3   :  { %v522_v7 = vpop.eup %521  ;;  %v196_v9 = vadd.f32 1.0, %v520_v5 }
  0xf4   :  { %447 = vmatprep.mubr.f32.mxu0 %v201_v6  ;;  %v195_v11 = vadd.f32 1.0, %v522_v7 }
  0xf5   :  { %448 = vmatmul.mubr.f32.vlgmr.msra.gmra.mrb[8].mxu0 %v202_v8  ;;  %v204_v17 = vmul.f32 %v196_v9, %v172_v12 }
  0xf6   :  { %v524_v13 = vpop.eup %523  ;;  %v203_v14 = vmul.f32 %v195_v11, %v171_v10 }
  0xf7   :  { %v526_v15 = vpop.eup %525  ;;  %v198_v16 = vadd.f32 1.0, %v524_v13 }
  0xf8   :  { %v197_v19 = vadd.f32 1.0, %v526_v15  ;;  %450 = vmatprep.mubr.f32.mxu1 %v203_v14 }
  0xf9   :  { %451 = vmatmul.mubr.f32.vlgmr.msra.gmra.mrb[0].mxu1 %v204_v17  ;;  %v206_v25 = vmul.f32 %v198_v16, %v174_v20 }
  0xfa   :  { %v528_v21 = vpop.eup %527  ;;  %v205_v22 = vmul.f32 %v197_v19, %v173_v18 }
  0xfb   :  { %v530_v23 = vpop.eup %529  ;;  %v200_v24 = vadd.f32 1.0, %v528_v21 }
  0xfc   :  { %v199_v27 = vadd.f32 1.0, %v530_v23  ;;  %453 = vmatprep.mubr.f32.mxu1 %v205_v22 }
  0xfd   :  { %454 = vmatmul.mubr.f32.gmra.mrb[2].mxu1 %v206_v25  ;;  %v208_v30 = vmul.f32 %v200_v24, %v176_v28 }
  0xfe   :  { %v207_v29 = vmul.f32 %v199_v27, %v175_v26 }
 0x100   :  { %456 = vmatprep.mubr.f32.mxu1 %v207_v29 }
 0x101   :  { %457 = vmatmul.mubr.f32.gmra.mrb[4].mxu1 %v208_v30 }
 0x1c8   :  { %v449_v32 = vpop.f32.mrb[8].mxu0 }
 0x1c9   :  { %v304_v33 = vadd.f32 %v449_v32, %v358_v31  ;;  %v298_v34 = vpop.f32.mrb[9].mxu0 }
 0x1ca   :  { %v299_v35 = vadd.f32 %v358_v31, %v298_v34 }
 0x1cb   :  { %338 = vst.msk [vmem:[%s696_s5 + $0x8] sm:$0xff] %vm39_vm0, %v304_v33 }
 0x1cc   :  { %337 = vst.msk [vmem:[%s696_s5] sm:$0xff] %vm39_vm0, %v299_v35  ;;  %v452_v36 = vpop.f32.mrb[0].mxu1 }
 0x1cd   :  { %v314_v37 = vadd.f32 %v452_v36, %v358_v31  ;;  %v308_v38 = vpop.f32.mrb[1].mxu1 }
 0x1ce   :  { %v309_v39 = vadd.f32 %v358_v31, %v308_v38 }
 0x1cf   :  { %340 = vst.msk [vmem:[%s696_s5 + $0x18] sm:$0xff] %vm39_vm0, %v314_v37 }
 0x1d0   :  { %339 = vst.msk [vmem:[%s696_s5 + $0x10] sm:$0xff] %vm39_vm0, %v309_v39  ;;  %v455_v40 = vpop.f32.mrb[2].mxu1 }
 0x1d1   :  { %v324_v41 = vadd.f32 %v455_v40, %v358_v31  ;;  %v318_v42 = vpop.f32.mrb[3].mxu1 }
 0x1d2   :  { %v319_v43 = vadd.f32 %v358_v31, %v318_v42 }
 0x1d3   :  { %342 = vst.msk [vmem:[%s696_s5 + $0x28] sm:$0xff] %vm39_vm0, %v324_v41 }
 0x1d4   :  { %341 = vst.msk [vmem:[%s696_s5 + $0x20] sm:$0xff] %vm39_vm0, %v319_v43  ;;  %v458_v44 = vpop.f32.mrb[4].mxu1 }
 0x1d5   :  { %v334_v45 = vadd.f32 %v458_v44, %v358_v31  ;;  %v328_v46 = vpop.f32.mrb[5].mxu1 }
 0x1d6   :  { %v329_v47 = vadd.f32 %v358_v31, %v328_v46 }
 0x1d7   :  { %344 = vst.msk [vmem:[%s696_s5 + $0x38] sm:$0xff] %vm39_vm0, %v334_v45 }
 0x1d8   :  { %343 = vst.msk [vmem:[%s696_s5 + $0x30] sm:$0xff] %vm39_vm0, %v329_v47 }

</bundles_post_ra>
